<compile_context>
chip_gen: v7x
topology: tpu7x:2x2x1
jax: 0.10.0
libtpu: 0.0.40
codegen_flags: <defaults>
</compile_context>

<pallas_src>
import jax
import jax.numpy as jnp
from jax import lax
from jax.experimental import pallas as pl
from jax.experimental.pallas import tpu as pltpu


def _round_up(a: int, b: int) -> int:
    return (a + b - 1) // b * b


def _make_corr2d_kernel(kh, kw, tile_h, chunk_h, w_pad, has_halo, out_dtype):
    """One grid step computes a (tile_h, w_pad) slab of the (padded) output."""
    ext = kh - 1                      # extra rows needed below each chunk
    n_chunks = tile_h // chunk_h
    n_main = n_chunks - 1 if has_halo else n_chunks   # chunks fully inside x_ref

    def kernel(*refs):
        if has_halo:
            x_ref, halo_ref, w_ref, b_ref, o_ref = refs
        else:
            x_ref, w_ref, b_ref, o_ref = refs
            halo_ref = None

        # Hoist all SMEM scalar reads (weights + bias) out of the tap loops.
        w_taps = [[w_ref[di * kw + dj] for dj in range(kw)] for di in range(kh)]
        b_val = b_ref[0]

        def shift_cols(a, dj):
            # a[:, c] -> a[:, c + dj]; the dj zero lanes appended on the right
            # only feed output columns >= w_out (discarded by the wrapper).
            if dj == 0:
                return a
            rows = a.shape[0]
            return jnp.concatenate(
                [a[:, dj:], jnp.zeros((rows, dj), a.dtype)], axis=1)

        def compute_chunk(slab):
            # slab: (chunk_h + ext, w_pad) in the input dtype.
            slab_f32 = slab.astype(jnp.float32)      # cast once per chunk
            acc = None
            for dj in range(kw):
                sh = shift_cols(slab_f32, dj)
                for di in range(kh):
                    term = w_taps[di][dj] * sh[di:di + chunk_h, :]
                    acc = term if acc is None else acc + term
            return (acc + b_val).astype(out_dtype)

        # Main chunks: every needed input row lives in the current tile.
        if n_main > 0:
            def body(c, carry):
                start = pl.multiple_of(c * chunk_h, chunk_h)
                slab = x_ref[pl.ds(start, chunk_h + ext), :]
                o_ref[pl.ds(start, chunk_h), :] = compute_chunk(slab)
                return carry
            lax.fori_loop(0, n_main, body, 0, unroll=n_main <= 4)

        # Last chunk of the tile: stitch the (kh-1)-row halo from the next tile.
        if has_halo:
            start = tile_h - chunk_h
            tail = jnp.concatenate(
                [x_ref[start:, :], halo_ref[0:ext, :]], axis=0)
            o_ref[pl.ds(start, chunk_h), :] = compute_chunk(tail)

    return kernel


def conv2d_forward(x, weight, bias, *, tile_h=None, compute_dtype=None,
                   out_dtype=None):
    """Pallas equivalent of Conv2D.forward: corr2d(x, weight) + bias."""
    h, w = x.shape
    kh, kw = weight.shape
    assert kh <= h and kw <= w, "kernel must fit inside the image"
    h_out, w_out = h - kh + 1, w - kw + 1

    in_dtype = (jnp.dtype(compute_dtype) if compute_dtype is not None
                else jnp.dtype(x.dtype))
    out_dtype = jnp.dtype(out_dtype) if out_dtype is not None else in_dtype
    # Sublane packing granularity for the input dtype (f32: 8, bf16: 16, i8: 32).
    sub = {4: 8, 2: 16, 1: 32}.get(in_dtype.itemsize, 8)

    has_halo = kh > 1
    halo_h = _round_up(kh - 1, sub) if has_halo else 0   # rows re-read from next tile
    unit = halo_h if has_halo else sub                    # row granularity

    # Lane-dense width: pad W up to a multiple of 128 (unmasked vst stores).
    w_pad = _round_up(max(w, 128), 128)

    # Inner strip-mine chunk: keep each chunk's f32 accumulator (and its input
    # slab) within ~128 KiB so the KH*KW taps stay register-resident.
    cap = max(unit, 256 // unit * unit)
    chunk_h = max(unit, min((128 * 1024) // (w_pad * 4) // unit * unit, cap))

    # Row tile (one grid step): default targets >= 8 tiles so the "parallel"
    # grid axis can shard across TensorCores (v7x) and the BlockSpec pipeline
    # has DMA to overlap; capped so double-buffered in+out blocks stay well
    # under the smallest per-core VMEM (64 MiB on v7x, 128 MiB on v5e/v6e).
    hint = pl.cdiv(h_out, 8) if tile_h is None else max(int(tile_h), 1)
    chunk_h = min(chunk_h, _round_up(hint, unit))
    tile_h = _round_up(hint, chunk_h)
    bytes_per_row = w_pad * (in_dtype.itemsize + out_dtype.itemsize)
    max_rows = max(chunk_h,
                   (12 * 1024 * 1024) // bytes_per_row // chunk_h * chunk_h)
    tile_h = max(chunk_h, min(tile_h, max_rows))
    n_tiles = pl.cdiv(h_out, tile_h)

    # Pad so every tile (and the last tile's halo) is in bounds. Padded rows /
    # columns only feed output elements that the final slice discards.
    h_pad = n_tiles * tile_h + halo_h
    if x.dtype == in_dtype and x.shape == (h_pad, w_pad):
        x_p = x                                        # already aligned: no copy
    else:
        x_p = jnp.zeros((h_pad, w_pad), in_dtype).at[:h, :w].set(
            x.astype(in_dtype))

    w_flat = weight.reshape(-1).astype(jnp.float32)    # 1-D SMEM scalars
    b_flat = bias.reshape(-1).astype(jnp.float32)

    kernel = _make_corr2d_kernel(kh, kw, tile_h, chunk_h, w_pad, has_halo,
                                 out_dtype)

    in_specs = [pl.BlockSpec((tile_h, w_pad), lambda i: (i, 0))]
    operands = [x_p]
    if has_halo:
        blocks_per_tile = tile_h // halo_h             # exact by construction
        in_specs.append(
            pl.BlockSpec((halo_h, w_pad),
                         lambda i: ((i + 1) * blocks_per_tile, 0)))
        operands.append(x_p)
    in_specs += [
        pl.BlockSpec(memory_space=pltpu.MemorySpace.SMEM),
        pl.BlockSpec(memory_space=pltpu.MemorySpace.SMEM),
    ]
    operands += [w_flat, b_flat]

    out_p = pl.pallas_call(
        kernel,
        out_shape=jax.ShapeDtypeStruct((n_tiles * tile_h, w_pad), out_dtype),
        grid=(n_tiles,),
        in_specs=in_specs,
        out_specs=pl.BlockSpec((tile_h, w_pad), lambda i: (i, 0)),
        compiler_params=pltpu.CompilerParams(
            # Row tiles are independent -> shard across the 2 TCs on v7x.
            dimension_semantics=("parallel",),
            vmem_limit_bytes=48 * 1024 * 1024,
        ),
    )(*operands)

    # Module semantics: exact (h_out, w_out) result.
    return out_p[:h_out, :w_out]


def _corr2d_ref(x, k, b):
    """Pure-JAX reference (shifted-slice formulation of corr2d) in f32."""
    kh, kw = k.shape
    h_out, w_out = x.shape[0] - kh + 1, x.shape[1] - kw + 1
    xf = x.astype(jnp.float32)
    y = jnp.zeros((h_out, w_out), jnp.float32)
    for di in range(kh):
        for dj in range(kw):
            y = y + k[di, dj] * xf[di:di + h_out, dj:dj + w_out]
    return y + b[0]


if __name__ == "__main__":
    key = jax.random.PRNGKey(0)
    k_x, k_w, k_b, k_x2 = jax.random.split(key, 4)

    # --- Test 1: the module's own example: X = ones((6, 8)), K = [[1, -1]]. ---
    x1 = jnp.ones((6, 8), jnp.float32)
    w1 = jnp.array([[1.0, -1.0]], jnp.float32)
    b1 = jnp.zeros((1,), jnp.float32)
    out1 = jax.block_until_ready(conv2d_forward(x1, w1, b1))
    ref1 = _corr2d_ref(x1, w1, b1)
    assert out1.shape == (6, 7)
    assert jnp.allclose(out1, ref1, atol=1e-5, rtol=1e-5)

    # --- Test 2: Conv2D-style params (weight ~ U[0,1)) on a larger image;
    # multiple row tiles so the halo path is exercised. ---
    x2 = jax.random.normal(k_x, (48, 200), dtype=jnp.float32)
    w2 = jax.random.uniform(k_w, (3, 4), dtype=jnp.float32)
    b2 = jax.random.normal(k_b, (1,), dtype=jnp.float32)
    out2 = jax.block_until_ready(conv2d_forward(x2, w2, b2, tile_h=16))
    ref2 = _corr2d_ref(x2, w2, b2)
    assert out2.shape == (46, 197)
    assert jnp.allclose(out2, ref2, atol=1e-4, rtol=1e-4)

    # --- Test 3: bf16 input + bf16 output path (halves HBM bytes both ways;
    # accumulation stays f32 in-kernel). Input quantization -> loose tolerance.
    out3 = jax.block_until_ready(
        conv2d_forward(x2, w2, b2, tile_h=32, compute_dtype=jnp.bfloat16))
    assert out3.dtype == jnp.bfloat16
    assert jnp.allclose(out3.astype(jnp.float32), ref2, atol=1e-1, rtol=5e-2)

    # --- Test 4: wide image so a tile splits into several inner chunks
    # (exercises the strip-mined fori_loop path plus the halo epilogue). ---
    x4 = jax.random.normal(k_x2, (64, 2000), dtype=jnp.float32)
    w4 = jax.random.uniform(k_w, (2, 2), dtype=jnp.float32)
    out4 = jax.block_until_ready(conv2d_forward(x4, w4, b2, tile_h=32))
    ref4 = _corr2d_ref(x4, w4, b2)
    assert out4.shape == (63, 1999)
    assert jnp.allclose(out4, ref4, atol=1e-4, rtol=1e-4)

    print("KERNEL_OK")
</pallas_src>

<mosaic_0001>
module attributes {stable_mosaic.version = 11 : i64} {
  func.func @kernel(%arg0: i32, %arg1: memref<8x128xf32, #tpu.memory_space<vmem>>, %arg2: memref<2xf32, #tpu.memory_space<smem>>, %arg3: memref<1xf32, #tpu.memory_space<smem>>, %arg4: memref<8x128xf32, #tpu.memory_space<vmem>>) attributes {dimension_semantics = [#tpu.dimension_semantics<parallel>], iteration_bounds = array<i64: 1>, scalar_prefetch = 0 : i64, scratch_operands = 0 : i64, tpu.core_type = #tpu.core_type<tc>, window_params = [{transform_indices = @transform_0, window_bounds = array<i64: 8, 128>}, {transform_indices = @transform_1, window_bounds = array<i64: 2>}, {transform_indices = @transform_2, window_bounds = array<i64: 1>}, {transform_indices = @transform_3, window_bounds = array<i64: 8, 128>}]} {
    %c0 = arith.constant 0 : index
    %0 = memref.load %arg2[%c0] : memref<2xf32, #tpu.memory_space<smem>>
    %c1 = arith.constant 1 : index
    %1 = memref.load %arg2[%c1] : memref<2xf32, #tpu.memory_space<smem>>
    %c0_0 = arith.constant 0 : index
    %2 = memref.load %arg3[%c0_0] : memref<1xf32, #tpu.memory_space<smem>>
    %c0_i32 = arith.constant 0 : i32
    %c8_i32 = arith.constant 8 : i32
    %3 = arith.muli %c0_i32, %c8_i32 : i32
    %4 = tpu.assume_multiple %3, 8 : i32
    %5 = arith.index_cast %4 : i32 to index
    %c0_1 = arith.constant 0 : index
    %6 = vector.load %arg1[%5, %c0_1] : memref<8x128xf32, #tpu.memory_space<vmem>>, vector<8x128xf32>
    %7 = vector.broadcast %0 : f32 to vector<8x128xf32>
    %8 = arith.mulf %7, %6 : vector<8x128xf32>
    %9 = vector.extract_strided_slice %6 {offsets = [0, 1], sizes = [8, 127], strides = [1, 1]} : vector<8x128xf32> to vector<8x127xf32>
    %cst = arith.constant 0.000000e+00 : f32
    %10 = vector.broadcast %cst : f32 to vector<8x1xf32>
    %11 = tpu.concatenate %9, %10 in 1 : vector<8x127xf32>, vector<8x1xf32> -> vector<8x128xf32>
    %12 = vector.broadcast %1 : f32 to vector<8x128xf32>
    %13 = arith.mulf %12, %11 : vector<8x128xf32>
    %14 = arith.addf %8, %13 : vector<8x128xf32>
    %15 = vector.broadcast %2 : f32 to vector<8x128xf32>
    %16 = arith.addf %14, %15 : vector<8x128xf32>
    %17 = arith.index_cast %4 : i32 to index
    %c0_2 = arith.constant 0 : index
    %18 = vector.load %arg4[%17, %c0_2] : memref<8x128xf32, #tpu.memory_space<vmem>>, vector<8x128xf32>
    tpu.vector_store %arg4[%17, %c0_2], %16 {strides = array<i32>} : memref<8x128xf32, #tpu.memory_space<vmem>>, vector<8x128xf32>,
    %c1_i32 = arith.constant 1 : i32
    return
  }
  func.func @transform_0(%arg0: i32) -> (i32, i32) {
    %c0_i32 = arith.constant 0 : i32
    %c0_i32_0 = arith.constant 0 : i32
    return %arg0, %c0_i32 : i32, i32
  }
  func.func @transform_1(%arg0: i32) -> i32 {
    %c0_i32 = arith.constant 0 : i32
    %c0_i32_0 = arith.constant 0 : i32
    return %c0_i32 : i32
  }
  func.func @transform_2(%arg0: i32) -> i32 {
    %c0_i32 = arith.constant 0 : i32
    %c0_i32_0 = arith.constant 0 : i32
    return %c0_i32 : i32
  }
  func.func @transform_3(%arg0: i32) -> (i32, i32) {
    %c0_i32 = arith.constant 0 : i32
    %c0_i32_0 = arith.constant 0 : i32
    return %arg0, %c0_i32 : i32, i32
  }
}

</mosaic_0001>

<bundles_post_ra>
// kernel: tpu_custom_call.1
= control target key start
LH: loop header
LB: loop body
LE: loop exit
PB: predicated region body
PF: predicated region fallthrough
CT: control target
= control target key end

     0   :  { %9 = vsyncpa [#allocation4], 0  ;;  %s196_s0 = inlined_call_operand.hbm [shape: f32[8,128], index: 0, kind: input, shape index: {}]   ;;  %s197_s1 = inlined_call_operand.vmem [shape: f32[2], index: 1, kind: input, shape index: {}]   ;;  %s198_s2 = inlined_call_operand.<no memory space> [shape: f32[1], index: 2, kind: input, shape index: {}]   ;;  %s199_s3 = inlined_call_operand.hbm [shape: f32[8,128], index: 3, kind: output, shape index: {}]  }
   0x1   :  { %10 = vsyncpa [#allocation6], 0 }
   0x2   :  { %11 = vsyncpa [#allocation5], 0  ;;  %s28_s14 = sshll.u32 %s197_s1, 4  ;;  %s142_s15 = smov [#allocation3]   ;;  %s29_s14 = int_to_ptr.vmem [resolvable:$true] %s28_s14 }
   0x3   :  { %s18_s16 = sshll.u32 %s142_s15, 4  ;;  %s80_s19 = scalar_lea.hbm %s196_s0, 128  ;;  %s19_s16 = int_to_ptr.vmem [resolvable:$true] %s18_s16 }
   0x4   :  { %p81_p0 = scmp.ne.s32.totalorder %s196_s0, %s80_s19  ;;  %p84_p1 = scmp.lt.u32.totalorder %s80_s19, %s196_s0 }
   0x6   :  { %p86_p2 = pnand %p84_p1, %p81_p0 }
   0x8   :  { %89 = shalt.err (!%p86_p2)
}
   0x9   :  { %s90_s24 = scalar_lea.vmem %s19_s16, 128  ;;  %p95_p4 = scmp.lt.s32.totalorder %s19_s16, %s19_s16 }
   0xa   :  { %p91_p3 = scmp.ne.s32.totalorder %s19_s16, %s90_s24  ;;  %p96_p5 = scmp.lt.s32.totalorder %s90_s24, %s90_s24 }
   0xc   :  { %p97_p6 = por %p96_p5, %p95_p4 }
   0xe   :  { %p98_p7 = pnand %p97_p6, %p91_p3 }
  0x10   :  { %101 = shalt.err (!%p98_p7)
}
  0x11   :  { %21 = dma.hbm_to_vmem [thread:$0]  %s196_s0, 128, %s19_s16, [#allocation4]  }
  0x12   :  { %s102_s26 = scalar_lea.vmem %s29_s14, 16  ;;  %p107_p9 = scmp.lt.s32.totalorder %s29_s14, %s29_s14 }
  0x13   :  { %p103_p8 = scmp.ne.s32.totalorder %s29_s14, %s102_s26  ;;  %p108_p10 = scmp.lt.s32.totalorder %s102_s26, %s102_s26 }
  0x15   :  { %p109_p11 = por %p108_p10, %p107_p9 }
  0x17   :  { %p110_p12 = pnand %p109_p11, %p103_p8 }
  0x19   :  { %113 = shalt.err (!%p110_p12)
}
  0x1a   :  { %s143_s27 = smov [#allocation7]  }
  0x1b   :  { %31 = dma.vmem_to_smem %s29_s14, 16, %s143_s27, [#allocation6]  }
  0x1c   :  { %136 = dma.done.wait [#allocation4], 128  }
  0x1d   :  { %137 = vsyncadd [#allocation4], 4294967168 }
  0x1e   :  { %138 = dma.done.wait [#allocation6], 16  }
  0x1f   :  { %139 = vsyncadd [#allocation6], 4294967280 }
  0x20   :  { %40 = sfence }
  0x21   :  { %v44_v0 = vld [vmem:[#allocation3] sm:$0xff]  ;;  %s144_s28 = smov 127   ;;  %s41_s29 = sld [smem:[#allocation7]]  ;;  %vm51_vm0 = vcmask 1039360   ;;  %v56_v7 = vstv %s198_s2 }
  0x22   :  { %48 = vrot.lane.b32.xlu0 %v44_v0, %s144_s28  ;;  %s75_s30 = sld [smem:[#allocation7 + $0x1]]  ;;  %s145_s5 = smov [#allocation8]  }
  0x23   :  { %s65_s6 = sshll.u32 %s145_s5, 4  ;;  %s66_s6 = int_to_ptr.vmem [resolvable:$true] %s65_s6 }
  0x24   :  { %s114_s7 = scalar_lea.vmem %s66_s6, 128  ;;  %p119_p0 = scmp.lt.s32.totalorder %s66_s6, %s66_s6 }
  0x25   :  { %p115_p13 = scmp.ne.s32.totalorder %s66_s6, %s114_s7  ;;  %p120_p1 = scmp.lt.s32.totalorder %s114_s7, %s114_s7 }
  0x27   :  { %v45_v1 = vstv %s41_s29  ;;  %p121_p2 = por %p120_p1, %p119_p0 }
  0x28   :  { %v53_v2 = vstv %s75_s30  ;;  %v46_v3 = vmul.f32 %v45_v1, %v44_v0 }
  0x29   :  { %p122_p3 = pnand %p121_p2, %p115_p13 }
  0x94   :  { %v49_v4 = vpop.permute.xlu0 %48 }
  0x95   :  { %v52_v5 = vsel %vm51_vm0, %v49_v4, 0.0 }
  0x96   :  { %v54_v6 = vmul.f32 %v53_v2, %v52_v5 }
  0x98   :  { %v55_v8 = vadd.f32 %v54_v6, %v46_v3 }
  0x9a   :  { %v57_v9 = vadd.f32 %v56_v7, %v55_v8 }
  0x9c   :  { %58 = vst [vmem:[#allocation8] sm:$0xff] %v57_v9 }
  0x9d   :  { %125 = shalt.err (!%p122_p3)
}
  0x9e   :  { %s126_s10 = scalar_lea.hbm %s199_s3, 128 }
  0x9f   :  { %p127_p4 = scmp.ne.s32.totalorder %s199_s3, %s126_s10  ;;  %p130_p5 = scmp.lt.u32.totalorder %s126_s10, %s199_s3 }
  0xa1   :  { %p132_p6 = pnand %p130_p5, %p127_p4 }
  0xa3   :  { %135 = shalt.err (!%p132_p6)
}
  0xa4   :  { %68 = dma.vmem_to_hbm [thread:$0]  %s66_s6, 128, %s199_s3, [#allocation5]  }
  0xa5   :  { %140 = dma.done.wait [#allocation5], 128  }
  0xa6   :  { %141 = vsyncadd [#allocation5], 4294967168 }
  0xa7   :  { %72 = vsyncpa [#allocation4], 1 }
  0xa8   :  { %73 = vsyncpa [#allocation5], 1 }
  0xa9   :  { %74 = vsyncpa [#allocation6], 1 }

</bundles_post_ra>
